<compile_context>
chip_gen: v5e
topology: v5e:2x2
jax: 0.10.0
libtpu: 0.0.40
codegen_flags: <defaults>
</compile_context>

<pallas_src>
import functools

import jax
import jax.numpy as jnp
from jax.experimental import pallas as pl
from jax.experimental.pallas import tpu as pltpu


def _round_up(x, m):
    return (x + m - 1) // m * m


def _pick_tile(total, target, quantum=128):
    """Largest multiple of `quantum` that divides `total` and is <= target."""
    best = quantum
    for t in range(quantum, min(total, max(target, quantum)) + 1, quantum):
        if total % t == 0:
            best = t
    return best


_FALLBACK_VMEM_CAP = 64 * 1024 * 1024  # v7x per-TC physical VMEM (smallest gen)


def _vmem_capacity_bytes():
    try:
        return int(pltpu.get_tpu_info().vmem_capacity_bytes)
    except Exception:
        return _FALLBACK_VMEM_CAP


def _gelu_tanh(x):
    # GELU with tanh approximation, matching nn.GELU(approximate='tanh').
    c = jnp.asarray(0.7978845608028654, dtype=x.dtype)  # sqrt(2/pi)
    k = jnp.asarray(0.044715, dtype=x.dtype)
    return 0.5 * x * (1.0 + jnp.tanh(c * (x + k * (x * x * x))))


# ------------------------------ kernels ------------------------------------


def _resident_kernel(x_ref, w1_ref, b1_ref, w2_ref, b2_ref, o_ref, *, act_dtype):
    """Single-pass MLP: weights fully resident in VMEM, grid = (row tiles,)."""
    h = jnp.dot(x_ref[...], w1_ref[...], preferred_element_type=jnp.float32)
    h = h + b1_ref[...].astype(jnp.float32)
    h = _gelu_tanh(h.astype(act_dtype))
    h = h.astype(w2_ref.dtype)
    out = jnp.dot(h, w2_ref[...], preferred_element_type=jnp.float32)
    o_ref[...] = (out + b2_ref[...].astype(jnp.float32)).astype(o_ref.dtype)


def _tiled_kernel(x_ref, w1_ref, b1_ref, w2_ref, b2_ref, o_ref, acc_ref, *, act_dtype):
    """Hidden-tiled MLP: grid = (row tiles, hidden tiles), f32 accumulator."""
    j = pl.program_id(1)

    @pl.when(j == 0)
    def _init():
        acc_ref[...] = jnp.zeros_like(acc_ref)

    h = jnp.dot(x_ref[...], w1_ref[...], preferred_element_type=jnp.float32)
    h = h + b1_ref[...].astype(jnp.float32)
    h = _gelu_tanh(h.astype(act_dtype))
    h = h.astype(w2_ref.dtype)
    acc_ref[...] += jnp.dot(h, w2_ref[...], preferred_element_type=jnp.float32)

    @pl.when(j == pl.num_programs(1) - 1)
    def _finalize():
        o_ref[...] = (acc_ref[...] + b2_ref[...].astype(jnp.float32)).astype(
            o_ref.dtype
        )


# ------------------------------ wrapper ------------------------------------


def prepare_mlp_params(w_fc, b_fc, w_proj, b_proj, *, compute_dtype=None):
    """One-time weight prep (do NOT call per forward pass).

    Transposes torch-layout (out, in) Linear weights to (in, out) and zero-pads
    D and H so every kernel tile is lane-dense. Pass compute_dtype=jnp.bfloat16
    to run the MXU at full bf16 rate (recommended on all generations).
    """
    H, D = w_fc.shape  # c_fc.weight is (4D, D)
    D_pad = _round_up(D, 128)
    H_pad = _round_up(H, 128)
    if H_pad >= 512:
        # Hidden tiles of the streaming path come in 512-wide steps; padding
        # with zero columns/rows is numerically inert.
        H_pad = _round_up(H_pad, 512)

    w1 = jnp.pad(w_fc.T, ((0, D_pad - D), (0, H_pad - H)))        # (D_pad, H_pad)
    w2 = jnp.pad(w_proj.T, ((0, H_pad - H), (0, D_pad - D)))      # (H_pad, D_pad)
    b1 = jnp.pad(b_fc, (0, H_pad - H)).reshape(1, H_pad).astype(jnp.float32)
    b2 = jnp.pad(b_proj, (0, D_pad - D)).reshape(1, D_pad).astype(jnp.float32)

    if compute_dtype is not None:
        w1 = w1.astype(compute_dtype)
        w2 = w2.astype(compute_dtype)
    return w1, b1, w2, b2


@functools.partial(
    jax.jit, static_argnames=("tm", "th_target", "gelu_in_low_precision")
)
def mlp_pallas(x, params, *, tm=512, th_target=2048, gelu_in_low_precision=False):
    """x: (B, T, D).  params: output of prepare_mlp_params()."""
    w1, b1, w2, b2 = params
    B, T, D = x.shape
    D_pad, H_pad = w1.shape
    M = B * T

    cdtype = w1.dtype
    wbytes = jnp.dtype(cdtype).itemsize
    obytes = jnp.dtype(x.dtype).itemsize
    # Sub-32-bit dtypes pack along sublanes: min row quantum is 16 for bf16.
    row_q = 16 if min(wbytes, obytes) < 4 else 8

    # Row tile: big enough to amortize weight DMA, but tight for small M.
    tm_eff = min(tm, _round_up(M, row_q))
    # Guarantee >=2 row tiles when M is small so both v7x TensorCores get work.
    if M <= tm_eff and tm_eff >= 2 * row_q:
        tm_eff = _round_up((tm_eff + 1) // 2, row_q)
    M_pad = _round_up(M, tm_eff)

    # GELU dtype: f32 by default (exact + v5e-safe); bf16 opt-in for v6e/v7x.
    act_dtype = cdtype if (gelu_in_low_precision and wbytes < 4) else jnp.float32

    # Device VMEM budget (v7x: 64 MiB/TC, v5e/v6e: 128 MiB), with headroom.
    vmem_cap = _vmem_capacity_bytes()
    usable = int(vmem_cap * 0.85)

    xbytes = wbytes  # x is cast to the weight compute dtype below
    bias_bytes = 2 * (H_pad + D_pad) * 4

    # --- weight-resident fast path estimate (weights DMA'd once per call) ---
    est_resident = (
        2 * tm_eff * D_pad * xbytes            # x tiles (double-buffered)
        + 2 * tm_eff * D_pad * obytes          # out tiles (double-buffered)
        + 2 * 2 * D_pad * H_pad * wbytes       # W1 + W2 fully resident
        + bias_bytes
        + tm_eff * H_pad * 4                   # (tm, H) f32 GELU intermediate
        + tm_eff * D_pad * 4                   # second matmul result
    )
    use_resident = est_resident <= usable

    x2 = x.reshape(M, D)
    if (M_pad, D_pad) != (M, D):
        x2 = jnp.pad(x2, ((0, M_pad - M), (0, D_pad - D)))
    x2 = x2.astype(cdtype)

    if use_resident:
        grid = (M_pad // tm_eff,)
        kernel = functools.partial(_resident_kernel, act_dtype=act_dtype)
        in_specs = [
            pl.BlockSpec((tm_eff, D_pad), lambda i: (i, 0)),   # x rows
            pl.BlockSpec((D_pad, H_pad), lambda i: (0, 0)),    # W1 (resident)
            pl.BlockSpec((1, H_pad), lambda i: (0, 0)),        # b1
            pl.BlockSpec((H_pad, D_pad), lambda i: (0, 0)),    # W2 (resident)
            pl.BlockSpec((1, D_pad), lambda i: (0, 0)),        # b2
        ]
        out_spec = pl.BlockSpec((tm_eff, D_pad), lambda i: (i, 0))
        scratch = []
        dims = ("parallel",)
        vmem_limit = min(usable, max(32 * 1024 * 1024, int(1.25 * est_resident)))
    else:
        # Streaming fallback: tile the hidden dim, accumulate c_proj in f32.
        tH = _pick_tile(H_pad, th_target)
        est_tiled = (
            2 * tm_eff * D_pad * xbytes
            + 2 * tm_eff * D_pad * obytes
            + 2 * 2 * D_pad * tH * wbytes      # W1/W2 hidden tiles (dbl-buf)
            + bias_bytes
            + tm_eff * D_pad * 4               # f32 accumulator scratch
            + tm_eff * tH * 4                  # (tm, tH) GELU intermediate
        )
        grid = (M_pad // tm_eff, H_pad // tH)
        kernel = functools.partial(_tiled_kernel, act_dtype=act_dtype)
        in_specs = [
            pl.BlockSpec((tm_eff, D_pad), lambda i, j: (i, 0)),  # x rows
            pl.BlockSpec((D_pad, tH), lambda i, j: (0, j)),      # W1 H-tile
            pl.BlockSpec((1, tH), lambda i, j: (0, j)),          # b1 H-tile
            pl.BlockSpec((tH, D_pad), lambda i, j: (j, 0)),      # W2 H-tile
            pl.BlockSpec((1, D_pad), lambda i, j: (0, 0)),       # b2
        ]
        out_spec = pl.BlockSpec((tm_eff, D_pad), lambda i, j: (i, 0))
        scratch = [pltpu.VMEM((tm_eff, D_pad), jnp.float32)]
        dims = ("parallel", "arbitrary")
        vmem_limit = min(usable, max(32 * 1024 * 1024, int(1.25 * est_tiled)))

    out2 = pl.pallas_call(
        kernel,
        out_shape=jax.ShapeDtypeStruct((M_pad, D_pad), x.dtype),
        grid_spec=pltpu.PrefetchScalarGridSpec(
            num_scalar_prefetch=0,
            grid=grid,
            in_specs=in_specs,
            out_specs=out_spec,
            scratch_shapes=scratch,
        ),
        compiler_params=pltpu.CompilerParams(
            dimension_semantics=dims,
            vmem_limit_bytes=int(vmem_limit),
        ),
    )(x2, w1, b1, w2, b2)

    return out2[:M, :D].reshape(B, T, D)


def mlp_reference(x, w_fc, b_fc, w_proj, b_proj):
    h = jnp.einsum("btd,hd->bth", x, w_fc) + b_fc
    h = _gelu_tanh(h)
    return jnp.einsum("bth,dh->btd", h, w_proj) + b_proj


if __name__ == "__main__":
    # Small GPT-style config: batch=2, seq=8, n_embd=32 -> hidden=128.
    B, T, D = 2, 8, 32
    H = 4 * D

    key = jax.random.PRNGKey(0)
    kx, k1, k2, k3, k4 = jax.random.split(key, 5)

    x = jax.random.normal(kx, (B, T, D), dtype=jnp.float32)
    # nn.Linear(n_embd, 4*n_embd).weight has shape (4D, D)
    w_fc = jax.random.normal(k1, (H, D), dtype=jnp.float32) * 0.02
    b_fc = jax.random.normal(k2, (H,), dtype=jnp.float32) * 0.02
    # nn.Linear(4*n_embd, n_embd).weight has shape (D, 4D)
    w_proj = jax.random.normal(k3, (D, H), dtype=jnp.float32) * 0.02
    b_proj = jax.random.normal(k4, (D,), dtype=jnp.float32) * 0.02

    # One-time weight prep (transpose + pad). For production, pass
    # compute_dtype=jnp.bfloat16 (and gelu_in_low_precision=True on v6e/v7x)
    # for full-rate MXU; demo stays f32 so the tight check vs f32 ref holds.
    params = prepare_mlp_params(w_fc, b_fc, w_proj, b_proj)

    out = mlp_pallas(x, params)
    out = jax.block_until_ready(out)

    ref = mlp_reference(x, w_fc, b_fc, w_proj, b_proj)
    assert out.shape == (B, T, D)
    assert jnp.allclose(out, ref, atol=1e-4, rtol=1e-4), "mismatch vs reference"

    print("KERNEL_OK")
</pallas_src>

<mosaic_0001>
module attributes {stable_mosaic.version = 11 : i64} {
  func.func @_resident_kernel(%arg0: i32, %arg1: memref<8x128xf32, #tpu.memory_space<vmem>>, %arg2: memref<128x128xf32, #tpu.memory_space<vmem>>, %arg3: memref<1x128xf32, #tpu.memory_space<vmem>>, %arg4: memref<128x128xf32, #tpu.memory_space<vmem>>, %arg5: memref<1x128xf32, #tpu.memory_space<vmem>>, %arg6: memref<8x128xf32, #tpu.memory_space<vmem>>) attributes {dimension_semantics = [#tpu.dimension_semantics<parallel>], iteration_bounds = array<i64: 2>, scalar_prefetch = 0 : i64, scratch_operands = 0 : i64, tpu.core_type = #tpu.core_type<tc>, window_params = [{transform_indices = @transform_0, window_bounds = array<i64: 8, 128>}, {pipeline_mode = #tpu.pipeline_mode<synchronous>, transform_indices = @transform_1, window_bounds = array<i64: 128, 128>}, {pipeline_mode = #tpu.pipeline_mode<synchronous>, transform_indices = @transform_2, window_bounds = array<i64: 1, 128>}, {pipeline_mode = #tpu.pipeline_mode<synchronous>, transform_indices = @transform_3, window_bounds = array<i64: 128, 128>}, {pipeline_mode = #tpu.pipeline_mode<synchronous>, transform_indices = @transform_4, window_bounds = array<i64: 1, 128>}, {transform_indices = @transform_5, window_bounds = array<i64: 8, 128>}]} {
    %c0 = arith.constant 0 : index
    %c0_0 = arith.constant 0 : index
    %0 = vector.load %arg1[%c0, %c0_0] : memref<8x128xf32, #tpu.memory_space<vmem>>, vector<8x128xf32>
    %c0_1 = arith.constant 0 : index
    %c0_2 = arith.constant 0 : index
    %1 = vector.load %arg2[%c0_1, %c0_2] : memref<128x128xf32, #tpu.memory_space<vmem>>, vector<128x128xf32>
    %cst = arith.constant dense<0.000000e+00> : vector<8x128xf32>
    %2 = tpu.matmul %0, %1, %cst {dimension_numbers = #tpu.dot_dimension_numbers<[1], [0], [0], [1], [0, 0, 1, 1], [], []>} : vector<8x128xf32>, vector<128x128xf32>, vector<8x128xf32> -> vector<8x128xf32>
    %c0_3 = arith.constant 0 : index
    %c0_4 = arith.constant 0 : index
    %3 = vector.load %arg3[%c0_3, %c0_4] : memref<1x128xf32, #tpu.memory_space<vmem>>, vector<1x128xf32>
    %4 = vector.broadcast %3 : vector<1x128xf32> to vector<8x128xf32>
    %5 = arith.addf %2, %4 : vector<8x128xf32>
    %cst_5 = arith.constant 5.000000e-01 : f32
    %6 = vector.broadcast %cst_5 : f32 to vector<8x128xf32>
    %7 = arith.mulf %6, %5 : vector<8x128xf32>
    %8 = arith.mulf %5, %5 : vector<8x128xf32>
    %9 = arith.mulf %8, %5 : vector<8x128xf32>
    %cst_6 = arith.constant 4.471500e-02 : f32
    %10 = vector.broadcast %cst_6 : f32 to vector<8x128xf32>
    %11 = arith.mulf %10, %9 : vector<8x128xf32>
    %12 = arith.addf %5, %11 : vector<8x128xf32>
    %cst_7 = arith.constant 0.797884583 : f32
    %13 = vector.broadcast %cst_7 : f32 to vector<8x128xf32>
    %14 = arith.mulf %13, %12 : vector<8x128xf32>
    %15 = math.tanh %14 : vector<8x128xf32>
    %cst_8 = arith.constant 1.000000e+00 : f32
    %16 = vector.broadcast %cst_8 : f32 to vector<8x128xf32>
    %17 = arith.addf %16, %15 : vector<8x128xf32>
    %18 = arith.mulf %7, %17 : vector<8x128xf32>
    %c0_9 = arith.constant 0 : index
    %c0_10 = arith.constant 0 : index
    %19 = vector.load %arg4[%c0_9, %c0_10] : memref<128x128xf32, #tpu.memory_space<vmem>>, vector<128x128xf32>
    %cst_11 = arith.constant dense<0.000000e+00> : vector<8x128xf32>
    %20 = tpu.matmul %18, %19, %cst_11 {dimension_numbers = #tpu.dot_dimension_numbers<[1], [0], [0], [1], [0, 0, 1, 1], [], []>} : vector<8x128xf32>, vector<128x128xf32>, vector<8x128xf32> -> vector<8x128xf32>
    %c0_12 = arith.constant 0 : index
    %c0_13 = arith.constant 0 : index
    %21 = vector.load %arg5[%c0_12, %c0_13] : memref<1x128xf32, #tpu.memory_space<vmem>>, vector<1x128xf32>
    %22 = vector.broadcast %21 : vector<1x128xf32> to vector<8x128xf32>
    %23 = arith.addf %20, %22 : vector<8x128xf32>
    %c0_14 = arith.constant 0 : index
    %c0_15 = arith.constant 0 : index
    %24 = vector.load %arg6[%c0_14, %c0_15] : memref<8x128xf32, #tpu.memory_space<vmem>>, vector<8x128xf32>
    tpu.vector_store %arg6[%c0_14, %c0_15], %23 {strides = array<i32>} : memref<8x128xf32, #tpu.memory_space<vmem>>, vector<8x128xf32>,
    return
  }
  func.func @transform_0(%arg0: i32) -> (i32, i32) {
    %c0_i32 = arith.constant 0 : i32
    %c0_i32_0 = arith.constant 0 : i32
    return %arg0, %c0_i32 : i32, i32
  }
  func.func @transform_1(%arg0: i32) -> (i32, i32) {
    %c0_i32 = arith.constant 0 : i32
    %c0_i32_0 = arith.constant 0 : i32
    %c0_i32_1 = arith.constant 0 : i32
    return %c0_i32, %c0_i32_0 : i32, i32
  }
  func.func @transform_2(%arg0: i32) -> (i32, i32) {
    %c0_i32 = arith.constant 0 : i32
    %c0_i32_0 = arith.constant 0 : i32
    %c0_i32_1 = arith.constant 0 : i32
    return %c0_i32, %c0_i32_0 : i32, i32
  }
  func.func @transform_3(%arg0: i32) -> (i32, i32) {
    %c0_i32 = arith.constant 0 : i32
    %c0_i32_0 = arith.constant 0 : i32
    %c0_i32_1 = arith.constant 0 : i32
    return %c0_i32, %c0_i32_0 : i32, i32
  }
  func.func @transform_4(%arg0: i32) -> (i32, i32) {
    %c0_i32 = arith.constant 0 : i32
    %c0_i32_0 = arith.constant 0 : i32
    %c0_i32_1 = arith.constant 0 : i32
    return %c0_i32, %c0_i32_0 : i32, i32
  }
  func.func @transform_5(%arg0: i32) -> (i32, i32) {
    %c0_i32 = arith.constant 0 : i32
    %c0_i32_0 = arith.constant 0 : i32
    return %arg0, %c0_i32 : i32, i32
  }
}

</mosaic_0001>

<bundles_post_ra>
// kernel: mlp_pallas.1
= control target key start
LH: loop header
LB: loop body
LE: loop exit
PB: predicated region body
PF: predicated region fallthrough
CT: control target
= control target key end

     0   :  { %10 = vsyncpa [#allocation3], 0  ;;  %s637_s0 = inlined_call_operand.vmem [shape: f32[16,128], index: 0, kind: input, shape index: {}]   ;;  %s638_s1 = inlined_call_operand.hbm [shape: f32[128,128], index: 1, kind: input, shape index: {}]   ;;  %s639_s2 = inlined_call_operand.vmem [shape: f32[1,128], index: 2, kind: input, shape index: {}]   ;;  %s640_s3 = inlined_call_operand.hbm [shape: f32[128,128], index: 3, kind: input, shape index: {}]   ;;  %s641_s4 = inlined_call_operand.vmem [shape: f32[1,128], index: 4, kind: input, shape index: {}]   ;;  %s642_s5 = inlined_call_operand.vmem [shape: f32[16,128], index: 5, kind: output, shape index: {}]  }
   0x1   :  { %11 = vsyncpa [#allocation5], 0  ;;  %s578_s18 = smov 0  }
   0x2 LB: > { %s169_s21 = sshll.u32 %s638_s1, 4  ;;  %s587_s22 = sadd.s32 4294967295, %s542_s18   ;;  %s542_s18 = sphi %s578_s18, %s17_s18   ;;  %s170_s21 = int_to_ptr.hbm [resolvable:$true] %s169_s21 }
   0x3   : > { %p422_p0 = scmp.ge.s32.totalorder %s542_s18, 1  ;;  %p158_p1 = scmp.lt.s32.totalorder %s542_s18, 3 }
   0x4   : > { %p448_p2 = scmp.eq.s32.totalorder %s587_s22, 0  ;;  %s544_s24 = smov [#allocation2]  }
   0x5   : > { %p592_p3 = pnand %p422_p0, %p158_p1  ;;  %s171_s25 = sshll.u32 %s544_s24, 4  ;;  %s172_s25 = int_to_ptr.vmem [resolvable:$true] %s171_s25 }
   0x6   : > { %s186_s28 = sshll.u32 %s640_s3, 4  ;;  %s545_s29 = smov [#allocation4]   ;;  %s187_s28 = int_to_ptr.hbm [resolvable:$true] %s186_s28 }
   0x7   : > { %p441_p4 = pneg %p592_p3  ;;  %s188_s30 = sshll.u32 %s545_s29, 4  ;;  %s189_s30 = int_to_ptr.vmem [resolvable:$true] %s188_s30 }
   0x8   : > { %s546_s6 = smov 128   ;;  %s547_s7 = smov 8  }
   0x9   : > { %p442_p5 = pnand %p448_p2, %p441_p4  ;;  %214 = sbr.rel (%p592_p3) target bundleno = 327 (0x147), region = 40 }
   0xb   : > { %444 = dma.hbm_to_vmem [thread:$0]  (!%p442_p5), %s170_s21, 2048, %s172_s25, [#allocation3], %s546_s6, %s546_s6, %s547_s7  }
   0xc   : > { %447 = dma.hbm_to_vmem [thread:$0]  (!%p442_p5), %s187_s28, 2048, %s189_s30, [#allocation5], %s546_s6, %s546_s6, %s547_s7  }
   0xe   : > { %533 = dma.done.wait (%p448_p2), [#allocation3], 2048  }
   0xf   : > { %535 = vsyncadd (%p448_p2), [#allocation3], 4294965248 }
  0x10   : > { %537 = dma.done.wait (%p448_p2), [#allocation5], 2048  }
  0x11   : > { %539 = vsyncadd (%p448_p2), [#allocation5], 4294965248  ;;  %v270_v0 = vld [vmem:[#allocation2 + $0x78] sm:$0xff]  ;;  %v269_v1 = vld [vmem:[#allocation2 + $0x70] sm:$0xff]  ;;  %p246_p6 = scmp.lt.s32.totalorder %s587_s22, 1 }
  0x12   : > { %275 = vmatpush.msra.mxu0 %v270_v0  ;;  %v268_v2 = vld [vmem:[#allocation2 + $0x68] sm:$0xff]  ;;  %v267_v3 = vld [vmem:[#allocation2 + $0x60] sm:$0xff]  ;;  %v319_v4 = vld [vmem:[#allocation4 + $0x78] sm:$0xff] }
  0x13   : > { %v266_v5 = vld [vmem:[#allocation2 + $0x58] sm:$0xff]  ;;  %324 = vmatpush.msra.mxu1 %v319_v4  ;;  %v318_v6 = vld [vmem:[#allocation4 + $0x70] sm:$0xff]  ;;  %v317_v7 = vld [vmem:[#allocation4 + $0x68] sm:$0xff]  ;;  %s645_s22 = smov (!%p246_p6, %s587_s22), 1 }
  0x14   : > { %276 = vmatpush.msra.mxu0 %v269_v1  ;;  %v265_v8 = vld [vmem:[#allocation2 + $0x50] sm:$0xff]  ;;  %v316_v9 = vld [vmem:[#allocation4 + $0x60] sm:$0xff]  ;;  %v264_v10 = vld [vmem:[#allocation2 + $0x48] sm:$0xff]  ;;  %s429_s8 = sshll.u32 %s645_s22, 3 }
  0x15   : > { %325 = vmatpush.msra.mxu1 %v318_v6  ;;  %v263_v11 = vld [vmem:[#allocation2 + $0x40] sm:$0xff]  ;;  %v262_v12 = vld [vmem:[#allocation2 + $0x38] sm:$0xff]  ;;  %v261_v13 = vld [vmem:[#allocation2 + $0x30] sm:$0xff]  ;;  %s249_s11 = scalar_lea.vmem %s637_s0, %s429_s8  ;;  %s253_s19 = scalar_lea.vmem %s642_s5, %s429_s8 }
  0x16   : > { %277 = vmatpush.msra.mxu0 %v268_v2  ;;  %v260_v14 = vld [vmem:[#allocation2 + $0x28] sm:$0xff]  ;;  %v259_v15 = vld [vmem:[#allocation2 + $0x20] sm:$0xff]  ;;  %v258_v16 = vld [vmem:[#allocation2 + $0x18] sm:$0xff] }
  0x17   : > { %326 = vmatpush.msra.mxu1 %v317_v7  ;;  %v257_v17 = vld [vmem:[#allocation2 + $0x10] sm:$0xff]  ;;  %v256_v18 = vld [vmem:[#allocation2 + $0x8] sm:$0xff]  ;;  %v255_v19 = vld [vmem:[#allocation2] sm:$0xff] }
  0x18   : > { %278 = vmatpush.msra.mxu0 %v267_v3  ;;  %v254_v20 = vld [vmem:[%s249_s11] sm:$0xff]  ;;  %v315_v21 = vld [vmem:[#allocation4 + $0x58] sm:$0xff]  ;;  %v314_v22 = vld [vmem:[#allocation4 + $0x50] sm:$0xff] }
  0x19   : > { %327 = vmatpush.msra.mxu1 %v316_v9  ;;  %v313_v23 = vld [vmem:[#allocation4 + $0x48] sm:$0xff]  ;;  %v312_v24 = vld [vmem:[#allocation4 + $0x40] sm:$0xff]  ;;  %v311_v25 = vld [vmem:[#allocation4 + $0x38] sm:$0xff] }
  0x1a   : > { %279 = vmatpush.msra.mxu0 %v266_v5  ;;  %v310_v26 = vld [vmem:[#allocation4 + $0x30] sm:$0xff]  ;;  %v309_v27 = vld [vmem:[#allocation4 + $0x28] sm:$0xff]  ;;  %v308_v28 = vld [vmem:[#allocation4 + $0x20] sm:$0xff] }
  0x1b   : > { %328 = vmatpush.msra.mxu1 %v315_v21  ;;  %v307_v29 = vld [vmem:[#allocation4 + $0x18] sm:$0xff]  ;;  %v306_v30 = vld [vmem:[#allocation4 + $0x10] sm:$0xff]  ;;  %v305_v31 = vld [vmem:[#allocation4 + $0x8] sm:$0xff] }
  0x1c   : > { %280 = vmatpush.msra.mxu0 %v265_v8  ;;  %v304_v32 = vld [vmem:[#allocation4] sm:$0xff] }
  0x1d   : > { %329 = vmatpush.msra.mxu1 %v314_v22  ;;  %v464_v33 = vld [vmem:[%s639_s2] ss:$0 sm:$0xff] }
  0x1e   : > { %281 = vmatpush.msra.mxu0 %v264_v10  ;;  %v465_v45 = vld [vmem:[%s641_s4] ss:$0 sm:$0xff] }
  0x1f   : > { %330 = vmatpush.msra.mxu1 %v313_v23 }
  0x20   : > { %282 = vmatpush.msra.mxu0 %v263_v11 }
  0x21   : > { %331 = vmatpush.msra.mxu1 %v312_v24 }
  0x22   : > { %283 = vmatpush.msra.mxu0 %v262_v12 }
  0x23   : > { %332 = vmatpush.msra.mxu1 %v311_v25 }
  0x24   : > { %284 = vmatpush.msra.mxu0 %v261_v13 }
  0x25   : > { %333 = vmatpush.msra.mxu1 %v310_v26 }
  0x26   : > { %285 = vmatpush.msra.mxu0 %v260_v14 }
  0x27   : > { %334 = vmatpush.msra.mxu1 %v309_v27 }
  0x28   : > { %286 = vmatpush.msra.mxu0 %v259_v15 }
  0x29   : > { %335 = vmatpush.msra.mxu1 %v308_v28 }
  0x2a   : > { %287 = vmatpush.msra.mxu0 %v258_v16 }
  0x2b   : > { %336 = vmatpush.msra.mxu1 %v307_v29 }
  0x2c   : > { %288 = vmatpush.msra.mxu0 %v257_v17 }
  0x2d   : > { %337 = vmatpush.msra.mxu1 %v306_v30 }
  0x2e   : > { %289 = vmatpush.msra.mxu0 %v256_v18 }
  0x2f   : > { %338 = vmatpush.msra.mxu1 %v305_v31 }
  0x30   : > { %290 = vmatpush.msra.mxu0 %v255_v19 }
  0x31   : > { %291 = vmatmul.f32.vlgmr.msra.gmra.mxu0 %v254_v20  ;;  %339 = vmatpush.msra.mxu1 %v304_v32 }
  0xae   : > { %v292_v34 = vpop.f32.mrf.mxu0 }
  0xaf   : > { %v293_v35 = vadd.f32 %v464_v33, %v292_v34 }
  0xb1   : > { %v296_v36 = vmul.f32 %v293_v35, %v293_v35  ;;  %v295_v42 = vmul.f32 0.5, %v293_v35 }
  0xb3   : > { %v297_v37 = vmul.f32 %v296_v36, %v293_v35 }
  0xb5   : > { %v298_v38 = vmul.f32 0.044715, %v297_v37 }
  0xb7   : > { %v299_v39 = vadd.f32 %v298_v38, %v293_v35 }
  0xb9   : > { %v300_v40 = vmul.f32 0.7978846, %v299_v39 }
  0xbb   : > { %466 = vtanh.f32 %v300_v40 }
  0xc1   : > { %v467_v41 = vpop.eup %466 }
  0xc2   : > { %v302_v43 = vadd.f32 1.0, %v467_v41 }
  0xc4   : > { %v303_v44 = vmul.f32 %v302_v43, %v295_v42 }
  0xc6   : > { %340 = vmatmul.f32.vlgmr.msra.gmra.mxu1 %v303_v44 }
 0x143   : > { %v341_v46 = vpop.f32.mrf.mxu1 }
 0x144   : > { %v342_v47 = vadd.f32 %v465_v45, %v341_v46 }
 0x146   : > { %344 = vst [vmem:[%s253_s19] sm:$0xff] %v342_v47 }
 0x147 PF: > { %s17_s18 = sadd.s32 1, %s542_s18  }
 0x148   : > { %p14_p7 = scmp.ge.s32.totalorder %s17_s18, 4  }
 0x14a   :  { %16 = sbr.rel (!%p14_p7) target bundleno = 2 (0x2), region = 79 }
 0x14f   :  { %364 = vsyncpa [#allocation3], 1 }
 0x150   :  { %366 = vsyncpa [#allocation3 + $0x1], 1 }
 0x151   :  { %367 = vsyncpa [#allocation5], 1 }

</bundles_post_ra>
